<compile_context>
chip_gen: v7x
topology: tpu7x:2x2x1
jax: 0.10.0
libtpu: 0.0.40
codegen_flags: <defaults>
</compile_context>

<pallas_src>
import functools

import jax
import jax.numpy as jnp
from jax.experimental import pallas as pl
from jax.experimental.pallas import tpu as pltpu

# ---- problem sizes (small, consistent with the module) -----------------
D_MRNA = 16
D_MIRNA = 12
D_CNB = 4
D_TMB = 2
D_CLIN = 6
D_TAIL = D_CNB + D_TMB + D_CLIN          # raw features fed straight to classifier
HIDDEN1 = 8                               # encoder1 width (fixed in the module)
HIDDEN2 = 4                               # encoder2 width (fixed in the module)
H_CODE = HIDDEN1 + HIDDEN2                # fused code width
LABEL_DIM = 2
BATCH = 8
INPUT_DIM = D_MRNA + D_MIRNA + D_TAIL     # = 40


def _round_up(n, m):
    return ((n + m - 1) // m) * m


def salmon_kernel(x_ref, w_enc_ref, b_enc_ref, wc_h_ref, wc_x_ref, bc_ref,
                  code_ref, pred_ref):
    """Fused SALMON forward on one batch tile.

    x     : [tb, 40]
    code  = sigmoid(x @ W_enc + b_enc)                       [tb, 12]
    pred  = sigmoid(code @ Wc_h + x @ Wc_x + bc)             [tb, 2]
    (W_enc block-diagonal / Wc_x zero-padded encode the original per-segment
     linears and the concat-based classifier exactly.)
    """
    x = x_ref[...]
    code = jax.nn.sigmoid(
        jnp.dot(x, w_enc_ref[...], preferred_element_type=jnp.float32)
        + b_enc_ref[...])
    logits = (jnp.dot(code, wc_h_ref[...], preferred_element_type=jnp.float32)
              + jnp.dot(x, wc_x_ref[...], preferred_element_type=jnp.float32)
              + bc_ref[...])
    code_ref[...] = code.astype(code_ref.dtype)
    pred_ref[...] = jax.nn.sigmoid(logits).astype(pred_ref.dtype)


@functools.partial(jax.jit, static_argnames=("block_b",))
def salmon_forward(x, packed, block_b=512):
    """Mirror of SALMON.forward for the full multi-omics branch.

    Returns (x_d, code, lbl_pred) with x_d = None, code = [code1 | code2].
    """
    B = x.shape[0]
    # sublane-aligned batch tile; one big tile per grid step, batch axis parallel.
    tb = min(block_b, _round_up(B, 8))
    Bp = _round_up(B, tb)
    xp = jnp.pad(x, ((0, Bp - B), (0, 0))) if Bp != B else x

    code, pred = pl.pallas_call(
        salmon_kernel,
        out_shape=(
            jax.ShapeDtypeStruct((Bp, H_CODE), jnp.float32),
            jax.ShapeDtypeStruct((Bp, LABEL_DIM), jnp.float32),
        ),
        grid=(Bp // tb,),
        in_specs=[
            pl.BlockSpec((tb, INPUT_DIM), lambda i: (i, 0)),           # x tile
            pl.BlockSpec((INPUT_DIM, H_CODE), lambda i: (0, 0)),       # W_enc
            pl.BlockSpec((1, H_CODE), lambda i: (0, 0)),               # b_enc
            pl.BlockSpec((H_CODE, LABEL_DIM), lambda i: (0, 0)),       # Wc_h
            pl.BlockSpec((INPUT_DIM, LABEL_DIM), lambda i: (0, 0)),    # Wc_x
            pl.BlockSpec((1, LABEL_DIM), lambda i: (0, 0)),            # bc
        ],
        out_specs=(
            pl.BlockSpec((tb, H_CODE), lambda i: (i, 0)),
            pl.BlockSpec((tb, LABEL_DIM), lambda i: (i, 0)),
        ),
        compiler_params=pltpu.CompilerParams(
            dimension_semantics=("parallel",)),   # v7x: 2 TCs split batch tiles
    )(xp, packed["w_enc"], packed["b_enc"],
      packed["wc_h"], packed["wc_x"], packed["bc"])

    if Bp != B:
        code = code[:B]
        pred = pred[:B]
    x_d = None
    return x_d, code, pred


def init_params(key):
    """Deterministic PyTorch-style Linear init: U(-1/sqrt(fan_in), 1/sqrt(fan_in))."""
    ks = jax.random.split(key, 6)

    def linear(kw, kb, fan_in, fan_out):
        bound = 1.0 / (fan_in ** 0.5)
        w = jax.random.uniform(kw, (fan_in, fan_out), jnp.float32, -bound, bound)
        b = jax.random.uniform(kb, (fan_out,), jnp.float32, -bound, bound)
        return w, b

    w1, b1 = linear(ks[0], ks[1], D_MRNA, HIDDEN1)
    w2, b2 = linear(ks[2], ks[3], D_MIRNA, HIDDEN2)
    clf_in = HIDDEN1 + HIDDEN2 + D_TAIL
    wc, bc = linear(ks[4], ks[5], clf_in, LABEL_DIM)
    return {"w1": w1, "b1": b1, "w2": w2, "b2": b2, "wc": wc, "bc": bc}


def pack_params(p):
    """One-time packing of the per-segment Linears into kernel-friendly form."""
    # block-diagonal encoder weight + fused bias
    w_enc = jnp.zeros((INPUT_DIM, H_CODE), jnp.float32)
    w_enc = w_enc.at[:D_MRNA, :HIDDEN1].set(p["w1"])
    w_enc = w_enc.at[D_MRNA:D_MRNA + D_MIRNA, HIDDEN1:].set(p["w2"])
    b_enc = jnp.concatenate([p["b1"], p["b2"]])[None, :]            # (1, 12)
    # classifier: rows acting on codes, and zero-padded rows acting on raw x tail
    wc_h = p["wc"][:H_CODE]                                         # (12, 2)
    wc_x = jnp.zeros((INPUT_DIM, LABEL_DIM), jnp.float32)
    wc_x = wc_x.at[D_MRNA + D_MIRNA:].set(p["wc"][H_CODE:])         # tail rows = wc3
    bc = p["bc"][None, :]                                           # (1, 2)
    return {"w_enc": w_enc, "b_enc": b_enc, "wc_h": wc_h, "wc_x": wc_x, "bc": bc}


def reference_forward(x, p):
    """Pure-JAX reference of the same branch for a correctness check."""
    x1 = x[:, :D_MRNA]
    x2 = x[:, D_MRNA:D_MRNA + D_MIRNA]
    xt = x[:, D_MRNA + D_MIRNA:]
    c1 = jax.nn.sigmoid(x1 @ p["w1"] + p["b1"])
    c2 = jax.nn.sigmoid(x2 @ p["w2"] + p["b2"])
    feat = jnp.concatenate([c1, c2, xt], axis=1)
    pred = jax.nn.sigmoid(feat @ p["wc"] + p["bc"])
    return jnp.concatenate([c1, c2], axis=1), pred


if __name__ == "__main__":
    key = jax.random.PRNGKey(0)
    kx, kp = jax.random.split(key)
    x = jax.random.normal(kx, (BATCH, INPUT_DIM), jnp.float32)
    params = init_params(kp)
    packed = pack_params(params)

    x_d, code, lbl_pred = salmon_forward(x, packed)
    code = jax.block_until_ready(code)
    lbl_pred = jax.block_until_ready(lbl_pred)

    code_ref, pred_ref = reference_forward(x, params)
    assert code.shape == (BATCH, H_CODE)
    assert lbl_pred.shape == (BATCH, LABEL_DIM)
    assert jnp.allclose(code, code_ref, atol=1e-5, rtol=1e-5)
    assert jnp.allclose(lbl_pred, pred_ref, atol=1e-5, rtol=1e-5)
    assert x_d is None

    print("KERNEL_OK")
</pallas_src>

<mosaic_0001>
module attributes {stable_mosaic.version = 11 : i64} {
  func.func @salmon_kernel(%arg0: i32, %arg1: memref<8x40xf32, #tpu.memory_space<vmem>>, %arg2: memref<40x12xf32, #tpu.memory_space<vmem>>, %arg3: memref<1x12xf32, #tpu.memory_space<vmem>>, %arg4: memref<12x2xf32, #tpu.memory_space<vmem>>, %arg5: memref<40x2xf32, #tpu.memory_space<vmem>>, %arg6: memref<1x2xf32, #tpu.memory_space<vmem>>, %arg7: memref<8x12xf32, #tpu.memory_space<vmem>>, %arg8: memref<8x2xf32, #tpu.memory_space<vmem>>) attributes {dimension_semantics = [#tpu.dimension_semantics<parallel>], iteration_bounds = array<i64: 1>, scalar_prefetch = 0 : i64, scratch_operands = 0 : i64, tpu.core_type = #tpu.core_type<tc>, window_params = [{transform_indices = @transform_0, window_bounds = array<i64: 8, 40>}, {pipeline_mode = #tpu.pipeline_mode<synchronous>, transform_indices = @transform_1, window_bounds = array<i64: 40, 12>}, {pipeline_mode = #tpu.pipeline_mode<synchronous>, transform_indices = @transform_2, window_bounds = array<i64: 1, 12>}, {pipeline_mode = #tpu.pipeline_mode<synchronous>, transform_indices = @transform_3, window_bounds = array<i64: 12, 2>}, {pipeline_mode = #tpu.pipeline_mode<synchronous>, transform_indices = @transform_4, window_bounds = array<i64: 40, 2>}, {pipeline_mode = #tpu.pipeline_mode<synchronous>, transform_indices = @transform_5, window_bounds = array<i64: 1, 2>}, {transform_indices = @transform_6, window_bounds = array<i64: 8, 12>}, {transform_indices = @transform_7, window_bounds = array<i64: 8, 2>}]} {
    %c0 = arith.constant 0 : index
    %c0_0 = arith.constant 0 : index
    %0 = vector.load %arg1[%c0, %c0_0] : memref<8x40xf32, #tpu.memory_space<vmem>>, vector<8x40xf32>
    %c0_1 = arith.constant 0 : index
    %c0_2 = arith.constant 0 : index
    %1 = vector.load %arg2[%c0_1, %c0_2] : memref<40x12xf32, #tpu.memory_space<vmem>>, vector<40x12xf32>
    %cst = arith.constant dense<0.000000e+00> : vector<8x12xf32>
    %2 = tpu.matmul %0, %1, %cst {dimension_numbers = #tpu.dot_dimension_numbers<[1], [0], [0], [1], [0, 0, 1, 1], [], []>} : vector<8x40xf32>, vector<40x12xf32>, vector<8x12xf32> -> vector<8x12xf32>
    %c0_3 = arith.constant 0 : index
    %c0_4 = arith.constant 0 : index
    %3 = vector.load %arg3[%c0_3, %c0_4] : memref<1x12xf32, #tpu.memory_space<vmem>>, vector<1x12xf32>
    %4 = vector.broadcast %3 : vector<1x12xf32> to vector<8x12xf32>
    %5 = arith.addf %2, %4 : vector<8x12xf32>
    %6 = arith.negf %5 : vector<8x12xf32>
    %7 = math.exp %6 : vector<8x12xf32>
    %cst_5 = arith.constant 1.000000e+00 : f32
    %8 = vector.broadcast %cst_5 : f32 to vector<8x12xf32>
    %9 = arith.addf %8, %7 : vector<8x12xf32>
    %10 = arith.divf %8, %9 : vector<8x12xf32>
    %c0_6 = arith.constant 0 : index
    %c0_7 = arith.constant 0 : index
    %11 = vector.load %arg4[%c0_6, %c0_7] : memref<12x2xf32, #tpu.memory_space<vmem>>, vector<12x2xf32>
    %cst_8 = arith.constant dense<0.000000e+00> : vector<8x2xf32>
    %12 = tpu.matmul %10, %11, %cst_8 {dimension_numbers = #tpu.dot_dimension_numbers<[1], [0], [0], [1], [0, 0, 1, 1], [], []>} : vector<8x12xf32>, vector<12x2xf32>, vector<8x2xf32> -> vector<8x2xf32>
    %c0_9 = arith.constant 0 : index
    %c0_10 = arith.constant 0 : index
    %13 = vector.load %arg5[%c0_9, %c0_10] : memref<40x2xf32, #tpu.memory_space<vmem>>, vector<40x2xf32>
    %cst_11 = arith.constant dense<0.000000e+00> : vector<8x2xf32>
    %14 = tpu.matmul %0, %13, %cst_11 {dimension_numbers = #tpu.dot_dimension_numbers<[1], [0], [0], [1], [0, 0, 1, 1], [], []>} : vector<8x40xf32>, vector<40x2xf32>, vector<8x2xf32> -> vector<8x2xf32>
    %15 = arith.addf %12, %14 : vector<8x2xf32>
    %c0_12 = arith.constant 0 : index
    %c0_13 = arith.constant 0 : index
    %16 = vector.load %arg6[%c0_12, %c0_13] : memref<1x2xf32, #tpu.memory_space<vmem>>, vector<1x2xf32>
    %17 = vector.broadcast %16 : vector<1x2xf32> to vector<8x2xf32>
    %18 = arith.addf %15, %17 : vector<8x2xf32>
    %c0_14 = arith.constant 0 : index
    %c0_15 = arith.constant 0 : index
    %19 = vector.load %arg7[%c0_14, %c0_15] : memref<8x12xf32, #tpu.memory_space<vmem>>, vector<8x12xf32>
    tpu.vector_store %arg7[%c0_14, %c0_15], %10 {strides = array<i32>} : memref<8x12xf32, #tpu.memory_space<vmem>>, vector<8x12xf32>,
    %20 = arith.negf %18 : vector<8x2xf32>
    %21 = math.exp %20 : vector<8x2xf32>
    %cst_16 = arith.constant 1.000000e+00 : f32
    %22 = vector.broadcast %cst_16 : f32 to vector<8x2xf32>
    %23 = arith.addf %22, %21 : vector<8x2xf32>
    %24 = arith.divf %22, %23 : vector<8x2xf32>
    %c0_17 = arith.constant 0 : index
    %c0_18 = arith.constant 0 : index
    %25 = vector.load %arg8[%c0_17, %c0_18] : memref<8x2xf32, #tpu.memory_space<vmem>>, vector<8x2xf32>
    tpu.vector_store %arg8[%c0_17, %c0_18], %24 {strides = array<i32>} : memref<8x2xf32, #tpu.memory_space<vmem>>, vector<8x2xf32>,
    return
  }
  func.func @transform_0(%arg0: i32) -> (i32, i32) {
    %c0_i32 = arith.constant 0 : i32
    %c0_i32_0 = arith.constant 0 : i32
    return %arg0, %c0_i32 : i32, i32
  }
  func.func @transform_1(%arg0: i32) -> (i32, i32) {
    %c0_i32 = arith.constant 0 : i32
    %c0_i32_0 = arith.constant 0 : i32
    %c0_i32_1 = arith.constant 0 : i32
    return %c0_i32, %c0_i32_0 : i32, i32
  }
  func.func @transform_2(%arg0: i32) -> (i32, i32) {
    %c0_i32 = arith.constant 0 : i32
    %c0_i32_0 = arith.constant 0 : i32
    %c0_i32_1 = arith.constant 0 : i32
    return %c0_i32, %c0_i32_0 : i32, i32
  }
  func.func @transform_3(%arg0: i32) -> (i32, i32) {
    %c0_i32 = arith.constant 0 : i32
    %c0_i32_0 = arith.constant 0 : i32
    %c0_i32_1 = arith.constant 0 : i32
    return %c0_i32, %c0_i32_0 : i32, i32
  }
  func.func @transform_4(%arg0: i32) -> (i32, i32) {
    %c0_i32 = arith.constant 0 : i32
    %c0_i32_0 = arith.constant 0 : i32
    %c0_i32_1 = arith.constant 0 : i32
    return %c0_i32, %c0_i32_0 : i32, i32
  }
  func.func @transform_5(%arg0: i32) -> (i32, i32) {
    %c0_i32 = arith.constant 0 : i32
    %c0_i32_0 = arith.constant 0 : i32
    %c0_i32_1 = arith.constant 0 : i32
    return %c0_i32, %c0_i32_0 : i32, i32
  }
  func.func @transform_6(%arg0: i32) -> (i32, i32) {
    %c0_i32 = arith.constant 0 : i32
    %c0_i32_0 = arith.constant 0 : i32
    return %arg0, %c0_i32 : i32, i32
  }
  func.func @transform_7(%arg0: i32) -> (i32, i32) {
    %c0_i32 = arith.constant 0 : i32
    %c0_i32_0 = arith.constant 0 : i32
    return %arg0, %c0_i32 : i32, i32
  }
}

</mosaic_0001>

<bundles_post_ra>
// kernel: salmon_forward.1
= control target key start
LH: loop header
LB: loop body
LE: loop exit
PB: predicated region body
PF: predicated region fallthrough
CT: control target
= control target key end

     0   :  { %v418_v3 = vmov 0.0|0.0   ;;  %vm419_vm0 = vmmov 0   ;;  %v420_v6 = vmov 0.0   ;;  %s528_s0 = inlined_call_operand.vmem [shape: f32[8,40], index: 0, kind: input, shape index: {}]   ;;  %s529_s1 = inlined_call_operand.vmem [shape: f32[40,12], index: 1, kind: input, shape index: {}]   ;;  %s530_s2 = inlined_call_operand.vmem [shape: f32[1,12], index: 2, kind: input, shape index: {}]   ;;  %s531_s3 = inlined_call_operand.vmem [shape: f32[12,2], index: 3, kind: input, shape index: {}]   ;;  %s532_s4 = inlined_call_operand.vmem [shape: f32[40,2], index: 4, kind: input, shape index: {}]   ;;  %s533_s5 = inlined_call_operand.vmem [shape: f32[1,2], index: 5, kind: input, shape index: {}]   ;;  %s534_s6 = inlined_call_operand.hbm [shape: f32[8,12], index: 6, kind: output, shape index: {0}]   ;;  %s535_s7 = inlined_call_operand.vmem [shape: f32[8,2], index: 7, kind: output, shape index: {1}]  }
   0x1   :  { %v27_v0 = vld [vmem:[%s529_s1] sm:$0xff]  ;;  %v28_v1 = vld [vmem:[%s529_s1 + $0x8] sm:$0xff]  ;;  %v29_v2 = vld [vmem:[%s529_s1 + $0x10] sm:$0xff]  ;;  %365 = vmatprep.subr.bf16.mxu0 %v418_v3  ;;  %342 = vmatprep.mubr.msk.f32.mxu0 %vm419_vm0, %v420_v6 }
   0x2   :  { %v366_v4 = vpack.c.bf16 %v28_v1, %v27_v0  ;;  %v30_v5 = vld [vmem:[%s529_s1 + $0x18] sm:$0xff]  ;;  %371 = vmatprep.subr.bf16.mxu1 %v418_v3  ;;  %355 = vmatprep.mubr.msk.f32.mxu1 %vm419_vm0, %v420_v6 }
   0x3   :  { %13 = vsyncpa [#allocation3], 0  ;;  %v369_v7 = vpack.c.bf16 %v30_v5, %v29_v2  ;;  %v31_v8 = vld [vmem:[%s529_s1 + $0x20] sm:$0xff]  ;;  %vm39_vm1 = vcmask 326656   ;;  %v122_v11 = vld [vmem:[%s532_s4 + $0x8] sm:$0xff]  ;;  %vm200_vm2 = vcmask 1043456  }
   0x4   :  { %367 = vmatpush3.bf16.msra.mxu0 %v366_v4  ;;  %v26_v9 = vld [vmem:[%s528_s0] sm:$0xff]  ;;  %v123_v13 = vld [vmem:[%s532_s4 + $0x10] sm:$0xff]  ;;  %v124_v14 = vld [vmem:[%s532_s4 + $0x18] sm:$0xff]  ;;  %vm421_vm3 = vmmov 1   ;;  %vm196_vm5 = vcmask 97280  }
   0x5   :  { %368 = vmatprep.subr.bf16.mxu0 %v418_v3  ;;  %v121_v10 = vld [vmem:[%s532_s4] sm:$0xff]  ;;  %v375_v16 = vpack.c.bf16 %v124_v14, %v123_v13  ;;  %v120_v17 = vld [vmem:[%s531_s3 + $0x8] sm:$0xf]  ;;  %vm379_vm4 = vmpackc.low %vm200_vm2, %vm421_vm3 }
   0x6   :  { %v372_v12 = vpack.c.bf16 %v122_v11, %v121_v10  ;;  %v119_v15 = vld [vmem:[%s531_s3] sm:$0xff]  ;;  %s422_s3 = smov [#allocation2]  }
   0x7   :  { %v378_v18 = vpack.c.bf16 %v120_v17, %v119_v15  ;;  %v125_v19 = vld [vmem:[%s532_s4 + $0x20] sm:$0xff]  ;;  %s297_s4 = sshll.u32 %s422_s3, 4  ;;  %s298_s4 = int_to_ptr.vmem [resolvable:$true] %s297_s4 }
   0x8   :  { %370 = vmatpush3.bf16.msra.mxu0 %v369_v7  ;;  %373 = vmatpush3.bf16.msra.mxu1 %v372_v12  ;;  %v309_v20 = vld [vmem:[%s530_s2] ss:$0 sm:$0xff]  ;;  %s394_s27 = scalar_lea.vmem %s298_s4, 128  ;;  %p399_p1 = scmp.lt.s32.totalorder %s298_s4, %s298_s4 }
   0x9   :  { %340 = vmatprep.subr.mxu0 %v420_v6  ;;  %374 = vmatprep.subr.bf16.mxu1 %v418_v3  ;;  %p395_p0 = scmp.ne.s32.totalorder %s298_s4, %s394_s27  ;;  %p400_p2 = scmp.lt.s32.totalorder %s394_s27, %s394_s27 }
   0xb   :  { %p401_p3 = por %p400_p2, %p399_p1 }
   0xc   :  { %341 = vmatpush3.msra.mxu0 %v31_v8  ;;  %376 = vmatpush3.bf16.msra.mxu1 %v375_v16 }
   0xd   :  { %343 = vmatmul.mubr.msk.f32.vlgmr.msra.gmra.mrb[0].mxu0 %vm39_vm1, %v26_v9  ;;  %377 = vmatprep.subr.bf16.mxu0 %v418_v3  ;;  %p402_p4 = pnand %p401_p3, %p395_p0 }
   0xe   :  { %362 = vmatprep.mubr.msk.f32.mxu0 %vm419_vm0, %v420_v6  ;;  %380 = vmatpush3.bf16.msk.msra.mxu0 %vm379_vm4, %v378_v18 }
   0xf   :  { %353 = vmatprep.subr.mxu1 %v420_v6 }
  0x10   :  { %354 = vmatpush3.msra.mxu1 %v125_v19 }
  0x11   :  { %356 = vmatmul.mubr.msk.f32.vlgmr.msra.gmra.mrb[0].mxu1 %vm39_vm1, %v26_v9 }
  0xe0   :  { %v109_v21 = vpop.f32.mrb[0].mxu0 }
  0xe1   :  { %v110_v22 = vadd.f32 %v309_v20, %v109_v21  ;;  %v344_v23 = vpop.f32.mrb[1].mxu0 }
  0xe3   :  { %v311_v24 = vmul.f32 -1.442695, %v110_v22 }
  0xe4   :  { %v192_v28 = vpop.f32.mrb[0].mxu1 }
  0xe5   :  { %386 = vpow2.f32 %v311_v24  ;;  %v357_v29 = vpop.f32.mrb[1].mxu1 }
  0xef   :  { %v387_v25 = vpop.eup %386 }
  0xf0   :  { %v116_v26 = vadd.f32 1.0, %v387_v25 }
  0xf2   :  { %388 = vrcp.f32 %v116_v26 }
  0xfc   :  { %v389_v27 = vpop.eup %388 }
  0xfd   :  { %363 = vmatmul.mubr.msk.f32.vlgmr.msra.gmra.mrb[2].mxu0 %vm196_vm5, %v389_v27  ;;  %282 = vst.msk [vmem:[#allocation2] sm:$0xff] %vm196_vm5, %v389_v27 }
  0xfe   :  { %405 = shalt.err (!%p402_p4)
}
  0xff   :  { %s406_s29 = scalar_lea.hbm %s534_s6, 128 }
 0x100   :  { %p407_p5 = scmp.ne.s32.totalorder %s534_s6, %s406_s29  ;;  %p410_p6 = scmp.lt.u32.totalorder %s406_s29, %s534_s6 }
 0x102   :  { %p412_p7 = pnand %p410_p6, %p407_p5 }
 0x104   :  { %415 = shalt.err (!%p412_p7)
}
 0x105   :  { %300 = dma.vmem_to_hbm [thread:$0]  %s298_s4, 128, %s534_s6, [#allocation3]   ;;  %v315_v31 = vld [vmem:[%s533_s5] ss:$0 sm:$0xff]  ;;  %vm289_vm6 = vcmask 15360  }
 0x1d0   :  { %v270_v30 = vpop.f32.mrb[2].mxu0 }
 0x1d1   :  { %v271_v32 = vadd.f32 %v270_v30, %v192_v28  ;;  %v364_v33 = vpop.f32.mrb[3].mxu0 }
 0x1d3   :  { %v281_v34 = vadd.f32 %v315_v31, %v271_v32 }
 0x1d5   :  { %v316_v35 = vmul.f32 -1.442695, %v281_v34 }
 0x1d7   :  { %390 = vpow2.f32 %v316_v35 }
 0x1e1   :  { %v391_v36 = vpop.eup %390 }
 0x1e2   :  { %v286_v37 = vadd.f32 1.0, %v391_v36 }
 0x1e4   :  { %392 = vrcp.f32 %v286_v37 }
 0x1ee   :  { %v393_v38 = vpop.eup %392 }
 0x1ef   :  { %290 = vst.msk [vmem:[%s535_s7] sm:$0xff] %vm289_vm6, %v393_v38 }
 0x1f0   :  { %416 = dma.done.wait [#allocation3], 128  }
 0x1f1   :  { %417 = vsyncadd [#allocation3], 4294967168 }
 0x1f2   :  { %308 = vsyncpa [#allocation3], 1 }

</bundles_post_ra>
